<compile_context>
chip_gen: v6e
topology: v6e:2x2x1
jax: 0.10.0
libtpu: 0.0.40
codegen_flags: <defaults>
</compile_context>

<pallas_src>
import jax
import jax.numpy as jnp
from jax import lax
from jax.experimental import pallas as pl
from jax.experimental.pallas import tpu as pltpu

_LANE = 128
_SUBLANE = 8
_BLOCK_BYTES = 2 * 1024 * 1024  # input bytes per block (Pallas double-buffers this)


def _make_wgen_loss_kernel(n_rows: int, block_rows: int, inv_n: float, needs_mask: bool):
    # All closure values are Python scalars/bools -> lowered as literals.
    def kernel(x_ref, o_ref, acc_ref):
        i = pl.program_id(0)

        @pl.when(i == 0)
        def _():
            acc_ref[...] = jnp.zeros_like(acc_ref)

        x = x_ref[...].astype(jnp.float32)

        if needs_mask:
            # Only emitted when the last block is partial: Pallas does not
            # zero-fill out-of-bounds rows, so zero them here.  Free filler on
            # the VPU for this HBM-bound kernel.
            rows_left = n_rows - i * block_rows
            row_ids = lax.broadcasted_iota(jnp.int32, (block_rows, _LANE), 0)
            x = jnp.where(row_ids < rows_left, x, 0.0)

        # Reduce the whole block to one (1, 128) vreg row (VPU adds + one sublane
        # reduce) and accumulate it; only ~512 B of accumulator traffic per step.
        acc_ref[...] += jnp.sum(x, axis=0, keepdims=True)

        @pl.when(i == pl.num_programs(0) - 1)
        def _():
            # Single cross-lane reduce + scale + negate, done once at the end.
            o_ref[0, 0] = -(jnp.sum(acc_ref[...]) * inv_n)

    return kernel


def wgen_loss(d_fake_prediction: jax.Array) -> jax.Array:
    """-mean(d_fake_prediction), computed in a Pallas TPU kernel."""
    x = d_fake_prediction
    n = x.size

    # Flatten (free for a contiguous array) and view as a lane-dense (rows, 128)
    # slab in the native dtype -- no f32 upcast copy in HBM.
    flat = x.reshape(-1)
    rows = pl.cdiv(n, _LANE)
    padded = rows * _LANE
    if padded != n:
        # Only when n is not a multiple of 128; keeps the last row lane-clean.
        flat = jnp.pad(flat, (0, padded - n))
    slab = flat.reshape(rows, _LANE)

    # Byte-budgeted block size in the native dtype (bf16 gets 2x the rows of f32),
    # rounded to the 8-sublane granule; large blocks amortize the ~0.35 us/step
    # grid overhead while staying well inside default scoped-VMEM limits.
    dtype_bytes = jnp.dtype(x.dtype).itemsize
    budget_rows = max(_SUBLANE, (_BLOCK_BYTES // (_LANE * dtype_bytes)) // _SUBLANE * _SUBLANE)
    block_rows = min(budget_rows, pl.cdiv(rows, _SUBLANE) * _SUBLANE)
    n_blocks = pl.cdiv(rows, block_rows)
    needs_mask = (rows % block_rows) != 0

    kernel = _make_wgen_loss_kernel(rows, block_rows, 1.0 / n, needs_mask)

    out = pl.pallas_call(
        kernel,
        out_shape=jax.ShapeDtypeStruct((1, 1), jnp.float32),
        grid_spec=pltpu.PrefetchScalarGridSpec(
            num_scalar_prefetch=0,
            grid=(n_blocks,),
            in_specs=[pl.BlockSpec((block_rows, _LANE), lambda i: (i, 0))],
            out_specs=pl.BlockSpec(
                (1, 1), lambda i: (0, 0), memory_space=pltpu.MemorySpace.SMEM
            ),
            scratch_shapes=[pltpu.VMEM((1, _LANE), jnp.float32)],
        ),
        compiler_params=pltpu.CompilerParams(
            dimension_semantics=("arbitrary",)
        ),
    )(slab)

    return out[0, 0].astype(x.dtype)


if __name__ == "__main__":
    key = jax.random.PRNGKey(0)
    # Discriminator prediction on fake images, NCHW-style output.
    d_fake_prediction = jax.random.normal(key, (2, 4, 16, 16), dtype=jnp.float32)

    loss = wgen_loss(d_fake_prediction)
    jax.block_until_ready(loss)

    ref = -jnp.mean(d_fake_prediction)
    assert jnp.allclose(loss, ref, atol=1e-5, rtol=1e-5), (loss, ref)

    print("KERNEL_OK")
</pallas_src>

<mosaic_0001>
module attributes {stable_mosaic.version = 11 : i64} {
  func.func @kernel(%arg0: i32, %arg1: memref<16x128xf32, #tpu.memory_space<vmem>>, %arg2: memref<1x1xf32, #tpu.memory_space<smem>>, %arg3: memref<1x128xf32, #tpu.memory_space<vmem>>) attributes {dimension_semantics = [#tpu.dimension_semantics<arbitrary>], iteration_bounds = array<i64: 1>, scalar_prefetch = 0 : i64, scratch_operands = 1 : i64, tpu.core_type = #tpu.core_type<tc>, window_params = [{transform_indices = @transform_0, window_bounds = array<i64: 16, 128>}, {transform_indices = @transform_1, window_bounds = array<i64: 1, 1>}]} {
    %c0_i32 = arith.constant 0 : i32
    %0 = arith.cmpi eq, %arg0, %c0_i32 : i32
    %1 = arith.extui %0 : i1 to i32
    %c0_i32_0 = arith.constant 0 : i32
    %2 = arith.cmpi ne, %1, %c0_i32_0 : i32
    scf.if %2 {
      %cst_8 = arith.constant 0.000000e+00 : f32
      %12 = vector.broadcast %cst_8 : f32 to vector<1x128xf32>
      %c0_9 = arith.constant 0 : index
      %c0_10 = arith.constant 0 : index
      %13 = vector.load %arg3[%c0_9, %c0_10] : memref<1x128xf32, #tpu.memory_space<vmem>>, vector<1x128xf32>
      tpu.vector_store %arg3[%c0_9, %c0_10], %12 {strides = array<i32>} : memref<1x128xf32, #tpu.memory_space<vmem>>, vector<1x128xf32>,
    } else {
    }
    %c0 = arith.constant 0 : index
    %c0_1 = arith.constant 0 : index
    %3 = vector.load %arg1[%c0, %c0_1] : memref<16x128xf32, #tpu.memory_space<vmem>>, vector<16x128xf32>
    %c0_2 = arith.constant 0 : index
    %c0_3 = arith.constant 0 : index
    %4 = vector.load %arg3[%c0_2, %c0_3] : memref<1x128xf32, #tpu.memory_space<vmem>>, vector<1x128xf32>
    %cst = arith.constant dense<0.000000e+00> : vector<128xf32>
    %5 = vector.multi_reduction <add>, %3, %cst [0] : vector<16x128xf32> to vector<128xf32>
    %6 = vector.shape_cast %5 : vector<128xf32> to vector<1x128xf32>
    %7 = arith.addf %4, %6 : vector<1x128xf32>
    %c0_4 = arith.constant 0 : index
    %c0_5 = arith.constant 0 : index
    %8 = vector.load %arg3[%c0_4, %c0_5] : memref<1x128xf32, #tpu.memory_space<vmem>>, vector<1x128xf32>
    tpu.vector_store %arg3[%c0_4, %c0_5], %7 {strides = array<i32>} : memref<1x128xf32, #tpu.memory_space<vmem>>, vector<1x128xf32>,
    %c0_i32_6 = arith.constant 0 : i32
    %9 = arith.cmpi eq, %arg0, %c0_i32_6 : i32
    %10 = arith.extui %9 : i1 to i32
    %c0_i32_7 = arith.constant 0 : i32
    %11 = arith.cmpi ne, %10, %c0_i32_7 : i32
    scf.if %11 {
      %c0_8 = arith.constant 0 : index
      %c0_9 = arith.constant 0 : index
      %12 = vector.load %arg3[%c0_8, %c0_9] : memref<1x128xf32, #tpu.memory_space<vmem>>, vector<1x128xf32>
      %13 = vector.shape_cast %12 : vector<1x128xf32> to vector<1x1x128xf32>
      %cst_10 = arith.constant dense<0.000000e+00> : vector<1xf32>
      %14 = vector.multi_reduction <add>, %13, %cst_10 [1, 2] : vector<1x1x128xf32> to vector<1xf32>
      %15 = vector.shape_cast %14 : vector<1xf32> to vector<1x1x1xf32>
      %16 = vector.extract %15[0, 0, 0] : f32 from vector<1x1x1xf32>
      %cst_11 = arith.constant 4.8828125E-4 : f32
      %17 = arith.mulf %16, %cst_11 : f32
      %cst_12 = arith.constant 0.000000e+00 : f32
      %18 = arith.subf %cst_12, %17 : f32
      %c0_13 = arith.constant 0 : index
      %c0_14 = arith.constant 0 : index
      %19 = memref.load %arg2[%c0_13, %c0_14] : memref<1x1xf32, #tpu.memory_space<smem>>
      memref.store %18, %arg2[%c0_13, %c0_14] : memref<1x1xf32, #tpu.memory_space<smem>>
    } else {
    }
    return
  }
  func.func @transform_0(%arg0: i32) -> (i32, i32) {
    %c0_i32 = arith.constant 0 : i32
    %c0_i32_0 = arith.constant 0 : i32
    return %arg0, %c0_i32 : i32, i32
  }
  func.func @transform_1(%arg0: i32) -> (i32, i32) {
    %c0_i32 = arith.constant 0 : i32
    %c0_i32_0 = arith.constant 0 : i32
    %c0_i32_1 = arith.constant 0 : i32
    return %c0_i32, %c0_i32_0 : i32, i32
  }
}

</mosaic_0001>

<bundles_post_ra>
// kernel: tpu_custom_call.1
= control target key start
LH: loop header
LB: loop body
LE: loop exit
PB: predicated region body
PF: predicated region fallthrough
CT: control target
= control target key end

     0   :  { %6 = vsyncpa [#allocation4], 0  ;;  %s133_s0 = inlined_call_operand.hbm [shape: f32[16,128], index: 0, kind: input, shape index: {}]   ;;  %s134_s1 = inlined_call_operand.hbm [shape: f32[1,1], index: 1, kind: output, shape index: {}]  }
   0x1   :  { %7 = vsyncpa [#allocation5], 0  ;;  %s112_s6 = smov [#allocation3]  }
   0x2   :  { %s13_s7 = sshll.u32 %s112_s6, 4  ;;  %s14_s7 = int_to_ptr.vmem [resolvable:$true] %s13_s7 }
   0x3   :  { %s88_s8 = scalar_lea.vmem %s14_s7, 256  ;;  %p93_p1 = scmp.lt.s32.totalorder %s14_s7, %s14_s7 }
   0x4   :  { %p89_p0 = scmp.ne.s32.totalorder %s14_s7, %s88_s8  ;;  %p94_p2 = scmp.lt.s32.totalorder %s88_s8, %s88_s8 }
   0x6   :  { %p95_p3 = por %p94_p2, %p93_p1 }
   0x8   :  { %p96_p4 = pnand %p95_p3, %p89_p0 }
   0xa   :  { %99 = shalt.err (!%p96_p4)
}
   0xb   :  { %s113_s9 = smov 128   ;;  %s114_s10 = smov 8  }
   0xc   :  { %19 = dma.hbm_to_vmem [thread:$0]  %s133_s0, 256, %s14_s7, [#allocation4], %s113_s9, %s113_s9, %s114_s10  }
   0xd   :  { %108 = dma.done.wait [#allocation4], 256  }
   0xe   :  { %109 = vsyncadd [#allocation4], 4294967040  ;;  %v115_v0 = vmov 0.0   ;;  %v28_v1 = vld [vmem:[#allocation3] sm:$0xff]  ;;  %v29_v2 = vld [vmem:[#allocation3 + $0x8] sm:$0xff]  ;;  %vm44_vm0 = vcmask 1040384  }
   0xf   :  { %27 = vst [vmem:[#allocation2] sm:$0x1] %v115_v0  ;;  %v31_v3 = vadd.f32 %v29_v2, %v28_v1  ;;  %s116_s15 = smov [#allocation6]  }
  0x11   :  { %v32_v4 = vrot.slane %v31_v3, 4 }
  0x13   :  { %v33_v5 = vadd.f32 %v32_v4, %v31_v3 }
  0x15   :  { %v34_v6 = vrot.slane %v33_v5, 2 }
  0x16   :  { %v30_v9 = vld [vmem:[#allocation2] sm:$0x1] }
  0x17   :  { %v35_v7 = vadd.f32 %v34_v6, %v33_v5 }
  0x19   :  { %v36_v8 = vrot.slane %v35_v7, 1 }
  0x1b   :  { %v37_v10 = vadd.f32 %v36_v8, %v35_v7 }
  0x1d   :  { %v38_v11 = vadd.f32 %v37_v10, %v30_v9 }
  0x1f   :  { %39 = vst [vmem:[#allocation2] sm:$0x1] %v38_v11 }
  0x26   :  { %v43_v12 = vld [vmem:[#allocation2] sm:$0x1] }
  0x27   :  { %v45_v13 = vsel %vm44_vm0, %v43_v12, 0.0 }
  0x28   :  { %46 = vadd.xlane.f32.xlu0 %v45_v13 }
  0xb1   :  { %v47_v14 = vpop.xlane.xlu0 %46 }
  0xb2   :  { %v48_v15 = vrot.slane %v47_v14, 4 }
  0xb4   :  { %v49_v16 = vadd.f32 %v48_v15, %v47_v14 }
  0xb6   :  { %v50_v17 = vrot.slane %v49_v16, 2 }
  0xb8   :  { %v51_v18 = vadd.f32 %v50_v17, %v49_v16 }
  0xba   :  { %v52_v19 = vrot.slane %v51_v18, 1 }
  0xbc   :  { %v53_v20 = vadd.f32 %v52_v19, %v51_v18 }
  0xbe   :  { %73 = vpush %v53_v20 }
  0xef   :  { %s74_s0 = spop %73 }
  0xf0   :  { %s55_s13 = smul.f32 0.00048828125, %s74_s0 }
  0xf2   :  { %s56_s14 = ssub.f32 0.0, %s55_s13 }
  0xf4   :  { %58 = sst [smem:[#allocation6]] %s56_s14 }
  0xf5   :  { %66 = dma.smem_to_hbm %s116_s15, 16, %s134_s1, [#allocation5]  }
  0xf6   :  { %110 = dma.done.wait [#allocation5], 16  }
  0xf7   :  { %111 = vsyncadd [#allocation5], 4294967280 }
  0xf8   :  { %70 = sfence }
  0xf9   :  { %71 = vsyncpa [#allocation4], 1 }
  0xfa   :  { %72 = vsyncpa [#allocation5], 1 }

</bundles_post_ra>
